<compile_context>
chip_gen: v7x
topology: tpu7x:2x2x1
jax: 0.10.0
libtpu: 0.0.40
codegen_flags: <defaults>
</compile_context>

<pallas_src>
import numpy as np
import jax
import jax.numpy as jnp
from jax import lax
from jax.experimental import pallas as pl
from jax.experimental.pallas import tpu as pltpu

_K1D = (0.05, 0.25, 0.4, 0.25, 0.05)   # fixed Gaussian from EdgeLoss.__init__
_EPS = 1e-3                            # CharbonnierLoss eps (torchkit default)
_EPS_SQ = _EPS * _EPS
_BLOCK_ELEMS = 768 * 1024              # ~3 MiB of padded f32 per input block


def _conv_matrix(n):
    """A (n,n) with (A @ x)[r] = sum_a k[a] * x[clamp(r + a - 2, 0, n-1)]:
    the 1-D 5-tap Gaussian with replicate padding as a dense operator."""
    a_mat = np.zeros((n, n), dtype=np.float64)
    for r in range(n):
        for a in range(5):
            j = min(max(r + a - 2, 0), n - 1)
            a_mat[r, j] += _K1D[a]
    return a_mat


def _laplacian_operators(h, w):
    """Fold conv_gauss -> even*4 -> conv_gauss into lap(x) = x - LH @ x @ RW.
    Returns (LH^T, RW) as float32 (LH^T because the kernel right-multiplies)."""
    ah = _conv_matrix(h)
    aw = _conv_matrix(w)
    eh = (np.arange(h) % 2 == 0).astype(np.float64)   # even rows
    ew = (np.arange(w) % 2 == 0).astype(np.float64)   # even cols
    lh = 4.0 * (ah * eh[None, :]) @ ah                # 4 * A_H D_H A_H   (HxH)
    rw = (aw.T * ew[None, :]) @ aw.T                  # A_W^T D_W A_W^T   (WxW)
    return jnp.asarray(lh.T, jnp.float32), jnp.asarray(rw, jnp.float32)


def edge_loss(y_hat, y, *, block_images=None):
    """EdgeLoss.forward(y_hat, y) -> scalar float32 (Charbonnier mean)."""
    n, c, h, w = y_hat.shape
    nc = n * c
    yh = y_hat.reshape(nc, h, w)
    yt = y.reshape(nc, h, w)

    # ---- images per grid step (bb), sized against the padded VMEM footprint ----
    pad_h = -(-h // 8) * 8
    pad_w = -(-w // 128) * 128
    per_image = pad_h * pad_w
    bb_max = max(1, min(nc, _BLOCK_ELEMS // per_image))
    if block_images is not None:
        bb_max = max(1, min(nc, int(block_images)))
    bb = 1
    for cand in range(bb_max, 0, -1):        # largest divisor of nc -> no padding
        if nc % cand == 0:
            bb = cand
            break
    steps = nc // bb
    min_steps = -(-nc // bb_max)
    pad = 0
    if steps > 4 * min_steps:
        # No decent divisor: fall back to full-size blocks + a zero-padded tail.
        bb = bb_max
        steps = min_steps
        pad = steps * bb - nc
        zpad = jnp.zeros((pad, h, w), yh.dtype)
        yh = jnp.concatenate([yh, zpad], axis=0)
        yt = jnp.concatenate([yt, zpad], axis=0)

    lht, rw = _laplacian_operators(h, w)

    def kernel(yh_ref, yt_ref, lht_ref, rw_ref, out_ref):
        # Difference of the whole block, flattened so both operator applications
        # are single large 2-D MXU matmuls (M = bb*h and M = bb*w).
        d2 = (yh_ref[...] - yt_ref[...]).astype(jnp.float32).reshape(bb * h, w)
        # blur = LH @ d @ RW  (per image), computed block-batched:
        t2 = jnp.dot(d2, rw_ref[...], preferred_element_type=jnp.float32)    # d @ RW
        tT = jnp.swapaxes(t2.reshape(bb, h, w), 1, 2).reshape(bb * w, h)     # (d RW)^T
        bT = jnp.dot(tT, lht_ref[...], preferred_element_type=jnp.float32)   # (LH d RW)^T
        blur = jnp.swapaxes(bT.reshape(bb, w, h), 1, 2).reshape(bb * h, w)
        lap = d2 - blur
        v = lap * lap + _EPS_SQ
        # Charbonnier partial sum for this block; sqrt(v) = v * rsqrt(v) -> EUP.
        s = jnp.sum(v * lax.rsqrt(v), axis=-1, keepdims=True)   # (bb*h, 1)
        s = jnp.sum(s, axis=0, keepdims=True)                   # (1, 1)
        out_ref[...] = s.reshape(1, 1, 1)

    partials = pl.pallas_call(
        kernel,
        out_shape=jax.ShapeDtypeStruct((steps, 1, 1), jnp.float32),
        grid_spec=pltpu.PrefetchScalarGridSpec(
            num_scalar_prefetch=0,
            grid=(steps,),
            in_specs=[
                pl.BlockSpec((bb, h, w), lambda i: (i, 0, 0)),
                pl.BlockSpec((bb, h, w), lambda i: (i, 0, 0)),
                # Constant index_map -> operators stay VMEM-resident (no re-DMA).
                pl.BlockSpec((h, h), lambda i: (0, 0)),
                pl.BlockSpec((w, w), lambda i: (0, 0)),
            ],
            out_specs=pl.BlockSpec((1, 1, 1), lambda i: (i, 0, 0)),
        ),
        compiler_params=pltpu.CompilerParams(
            dimension_semantics=("parallel",),
            vmem_limit_bytes=48 * 1024 * 1024,
        ),
    )(yh, yt, lht, rw)

    total = jnp.sum(partials)
    if pad:
        # Padded zero-diff images contribute exactly eps per element; remove it.
        eps_term = jnp.float32(_EPS_SQ) * lax.rsqrt(jnp.float32(_EPS_SQ))
        total = total - jnp.float32(pad * h * w) * eps_term
    # Charbonnier is a mean over the real (unpadded) N*C*H*W elements.
    return total / jnp.float32(nc * h * w)


# ----------------------- pure-JAX reference (for self-check) -----------------------
def _ref_conv_gauss(x):
    hh, ww = x.shape[-2:]
    p = jnp.pad(x, ((0, 0), (2, 2), (2, 2)), mode="edge")
    out = jnp.zeros_like(x)
    for a in range(5):
        for b in range(5):
            out = out + (_K1D[a] * _K1D[b]) * p[:, a:a + hh, b:b + ww]
    return out


def _ref_laplacian(x):
    hh, ww = x.shape[-2:]
    f = _ref_conv_gauss(x)
    mask = (jnp.arange(hh) % 2 == 0)[:, None] & (jnp.arange(ww) % 2 == 0)[None, :]
    nf = jnp.where(mask[None], f * 4.0, 0.0)
    return x - _ref_conv_gauss(nf)


def edge_loss_ref(y_hat, y):
    n, c, h, w = y_hat.shape
    yh = y_hat.reshape(n * c, h, w).astype(jnp.float32)
    yt = y.reshape(n * c, h, w).astype(jnp.float32)
    d = _ref_laplacian(yh) - _ref_laplacian(yt)
    return jnp.mean(jnp.sqrt(d * d + jnp.float32(_EPS_SQ)))


if __name__ == "__main__":
    key = jax.random.PRNGKey(0)
    k1, k2 = jax.random.split(key)
    # Module's conv kernel is repeated for 3 channels -> inputs are (N, 3, H, W).
    y_hat = jax.random.normal(k1, (2, 3, 16, 16), dtype=jnp.float32)
    y = jax.random.normal(k2, (2, 3, 16, 16), dtype=jnp.float32)

    loss = jax.jit(edge_loss)(y_hat, y)
    jax.block_until_ready(loss)

    ref = edge_loss_ref(y_hat, y)
    if not jnp.allclose(loss, ref, rtol=1e-3, atol=1e-4):
        raise AssertionError(f"mismatch: pallas={float(loss)} ref={float(ref)}")
    print("KERNEL_OK")
</pallas_src>

<mosaic_0001>
module attributes {stable_mosaic.version = 11 : i64} {
  func.func @kernel(%arg0: i32, %arg1: memref<6x16x16xf32, #tpu.memory_space<vmem>>, %arg2: memref<6x16x16xf32, #tpu.memory_space<vmem>>, %arg3: memref<16x16xf32, #tpu.memory_space<vmem>>, %arg4: memref<16x16xf32, #tpu.memory_space<vmem>>, %arg5: memref<1x1x1xf32, #tpu.memory_space<vmem>>) attributes {dimension_semantics = [#tpu.dimension_semantics<parallel>], iteration_bounds = array<i64: 1>, scalar_prefetch = 0 : i64, scratch_operands = 0 : i64, tpu.core_type = #tpu.core_type<tc>, window_params = [{transform_indices = @transform_0, window_bounds = array<i64: 6, 16, 16>}, {transform_indices = @transform_1, window_bounds = array<i64: 6, 16, 16>}, {pipeline_mode = #tpu.pipeline_mode<synchronous>, transform_indices = @transform_2, window_bounds = array<i64: 16, 16>}, {pipeline_mode = #tpu.pipeline_mode<synchronous>, transform_indices = @transform_3, window_bounds = array<i64: 16, 16>}, {transform_indices = @transform_4, window_bounds = array<i64: 1, 1, 1>}]} {
    %c0 = arith.constant 0 : index
    %c0_0 = arith.constant 0 : index
    %c0_1 = arith.constant 0 : index
    %0 = vector.load %arg1[%c0, %c0_0, %c0_1] : memref<6x16x16xf32, #tpu.memory_space<vmem>>, vector<6x16x16xf32>
    %c0_2 = arith.constant 0 : index
    %c0_3 = arith.constant 0 : index
    %c0_4 = arith.constant 0 : index
    %1 = vector.load %arg2[%c0_2, %c0_3, %c0_4] : memref<6x16x16xf32, #tpu.memory_space<vmem>>, vector<6x16x16xf32>
    %2 = arith.subf %0, %1 : vector<6x16x16xf32>
    %3 = vector.shape_cast %2 : vector<6x16x16xf32> to vector<96x16xf32>
    %c0_5 = arith.constant 0 : index
    %c0_6 = arith.constant 0 : index
    %4 = vector.load %arg4[%c0_5, %c0_6] : memref<16x16xf32, #tpu.memory_space<vmem>>, vector<16x16xf32>
    %cst = arith.constant dense<0.000000e+00> : vector<96x16xf32>
    %5 = tpu.matmul %3, %4, %cst {dimension_numbers = #tpu.dot_dimension_numbers<[1], [0], [0], [1], [0, 0, 1, 1], [], []>} : vector<96x16xf32>, vector<16x16xf32>, vector<96x16xf32> -> vector<96x16xf32>
    %6 = vector.shape_cast %5 : vector<96x16xf32> to vector<6x16x16xf32>
    %7 = tpu.transpose %6, [0, 2, 1] : vector<6x16x16xf32> -> vector<6x16x16xf32>
    %8 = vector.shape_cast %7 : vector<6x16x16xf32> to vector<96x16xf32>
    %c0_7 = arith.constant 0 : index
    %c0_8 = arith.constant 0 : index
    %9 = vector.load %arg3[%c0_7, %c0_8] : memref<16x16xf32, #tpu.memory_space<vmem>>, vector<16x16xf32>
    %cst_9 = arith.constant dense<0.000000e+00> : vector<96x16xf32>
    %10 = tpu.matmul %8, %9, %cst_9 {dimension_numbers = #tpu.dot_dimension_numbers<[1], [0], [0], [1], [0, 0, 1, 1], [], []>} : vector<96x16xf32>, vector<16x16xf32>, vector<96x16xf32> -> vector<96x16xf32>
    %11 = vector.shape_cast %10 : vector<96x16xf32> to vector<6x16x16xf32>
    %12 = tpu.transpose %11, [0, 2, 1] : vector<6x16x16xf32> -> vector<6x16x16xf32>
    %13 = vector.shape_cast %12 : vector<6x16x16xf32> to vector<96x16xf32>
    %14 = arith.subf %3, %13 : vector<96x16xf32>
    %15 = arith.mulf %14, %14 : vector<96x16xf32>
    %cst_10 = arith.constant 9.99999997E-7 : f32
    %16 = vector.broadcast %cst_10 : f32 to vector<96x16xf32>
    %17 = arith.addf %15, %16 : vector<96x16xf32>
    %18 = math.rsqrt %17 : vector<96x16xf32>
    %19 = arith.mulf %17, %18 : vector<96x16xf32>
    %cst_11 = arith.constant dense<0.000000e+00> : vector<96xf32>
    %20 = vector.multi_reduction <add>, %19, %cst_11 [1] : vector<96x16xf32> to vector<96xf32>
    %21 = vector.shape_cast %20 : vector<96xf32> to vector<96x1xf32>
    %cst_12 = arith.constant dense<0.000000e+00> : vector<1xf32>
    %22 = vector.multi_reduction <add>, %21, %cst_12 [0] : vector<96x1xf32> to vector<1xf32>
    %23 = vector.shape_cast %22 : vector<1xf32> to vector<1x1xf32>
    %24 = vector.shape_cast %23 : vector<1x1xf32> to vector<1x1x1xf32>
    %c0_13 = arith.constant 0 : index
    %c0_14 = arith.constant 0 : index
    %c0_15 = arith.constant 0 : index
    %25 = vector.load %arg5[%c0_13, %c0_14, %c0_15] : memref<1x1x1xf32, #tpu.memory_space<vmem>>, vector<1x1x1xf32>
    tpu.vector_store %arg5[%c0_13, %c0_14, %c0_15], %24 {strides = array<i32>} : memref<1x1x1xf32, #tpu.memory_space<vmem>>, vector<1x1x1xf32>,
    return
  }
  func.func @transform_0(%arg0: i32) -> (i32, i32, i32) {
    %c0_i32 = arith.constant 0 : i32
    %c0_i32_0 = arith.constant 0 : i32
    %c0_i32_1 = arith.constant 0 : i32
    return %arg0, %c0_i32, %c0_i32_0 : i32, i32, i32
  }
  func.func @transform_1(%arg0: i32) -> (i32, i32, i32) {
    %c0_i32 = arith.constant 0 : i32
    %c0_i32_0 = arith.constant 0 : i32
    %c0_i32_1 = arith.constant 0 : i32
    return %arg0, %c0_i32, %c0_i32_0 : i32, i32, i32
  }
  func.func @transform_2(%arg0: i32) -> (i32, i32) {
    %c0_i32 = arith.constant 0 : i32
    %c0_i32_0 = arith.constant 0 : i32
    %c0_i32_1 = arith.constant 0 : i32
    return %c0_i32, %c0_i32_0 : i32, i32
  }
  func.func @transform_3(%arg0: i32) -> (i32, i32) {
    %c0_i32 = arith.constant 0 : i32
    %c0_i32_0 = arith.constant 0 : i32
    %c0_i32_1 = arith.constant 0 : i32
    return %c0_i32, %c0_i32_0 : i32, i32
  }
  func.func @transform_4(%arg0: i32) -> (i32, i32, i32) {
    %c0_i32 = arith.constant 0 : i32
    %c0_i32_0 = arith.constant 0 : i32
    %c0_i32_1 = arith.constant 0 : i32
    return %arg0, %c0_i32, %c0_i32_0 : i32, i32, i32
  }
}

</mosaic_0001>

<bundles_post_ra>
// kernel: edge_loss.1
= control target key start
LH: loop header
LB: loop body
LE: loop exit
PB: predicated region body
PF: predicated region fallthrough
CT: control target
= control target key end

     0   :  { %9 = vsyncpa [#allocation3], 0  ;;  %s1351_s0 = inlined_call_operand.hbm [shape: f32[6,16,16], index: 0, kind: input, shape index: {}]   ;;  %s1352_s1 = inlined_call_operand.hbm [shape: f32[6,16,16], index: 1, kind: input, shape index: {}]   ;;  %s1353_s2 = inlined_call_operand.hbm [shape: f32[16,16], index: 2, kind: input, shape index: {}]   ;;  %s1354_s3 = inlined_call_operand.vmem [shape: f32[16,16], index: 3, kind: input, shape index: {}]   ;;  %s1355_s4 = inlined_call_operand.hbm [shape: f32[1,1,1], index: 4, kind: output, shape index: {}]  }
   0x1   :  { %10 = vsyncpa [#allocation6], 0 }
   0x2   :  { %11 = vsyncpa [#allocation4], 0  ;;  %s1166_s15 = smov [#allocation5]   ;;  %s1167_s17 = smov [#allocation2]  }
   0x3   :  { %s29_s16 = sshll.u32 %s1166_s15, 4  ;;  %s17_s18 = sshll.u32 %s1167_s17, 4  ;;  %s30_s16 = int_to_ptr.vmem [resolvable:$true] %s29_s16  ;;  %s1197_s18 = int_to_ptr.vmem [resolvable:$true] %s17_s18 }
   0x4   :  { %s1072_s21 = scalar_lea.hbm %s1352_s1, 1536 }
   0x5   :  { %p1073_p0 = scmp.ne.s32.totalorder %s1352_s1, %s1072_s21  ;;  %p1076_p1 = scmp.lt.u32.totalorder %s1072_s21, %s1352_s1 }
   0x7   :  { %p1078_p2 = pnand %p1076_p1, %p1073_p0 }
   0x9   :  { %1081 = shalt.err (!%p1078_p2)
}
   0xa   :  { %s1082_s26 = scalar_lea.vmem %s30_s16, 1536  ;;  %p1087_p4 = scmp.lt.s32.totalorder %s30_s16, %s30_s16 }
   0xb   :  { %p1083_p3 = scmp.ne.s32.totalorder %s30_s16, %s1082_s26  ;;  %p1088_p5 = scmp.lt.s32.totalorder %s1082_s26, %s1082_s26 }
   0xd   :  { %p1089_p6 = por %p1088_p5, %p1087_p4 }
   0xf   :  { %p1090_p7 = pnand %p1089_p6, %p1083_p3 }
  0x11   :  { %1093 = shalt.err (!%p1090_p7)
}
  0x12   :  { %s1168_s27 = smov 128   ;;  %s1169_s28 = smov 8  }
  0x13   :  { %35 = dma.hbm_to_vmem [thread:$0]  %s1352_s1, 1536, %s30_s16, [#allocation6], %s1168_s27, %s1168_s27, %s1169_s28  }
  0x14   :  { %s1094_s7 = scalar_lea.hbm %s1351_s0, 1536 }
  0x15   :  { %p1095_p8 = scmp.ne.s32.totalorder %s1351_s0, %s1094_s7  ;;  %p1098_p9 = scmp.lt.u32.totalorder %s1094_s7, %s1351_s0 }
  0x17   :  { %p1100_p10 = pnand %p1098_p9, %p1095_p8 }
  0x19   :  { %1103 = shalt.err (!%p1100_p10)
}
  0x1a   :  { %s1104_s12 = scalar_lea.vmem %s1197_s18, 1536  ;;  %p1109_p12 = scmp.lt.s32.totalorder %s1197_s18, %s1197_s18 }
  0x1b   :  { %p1105_p11 = scmp.ne.s32.totalorder %s1197_s18, %s1104_s12  ;;  %p1110_p13 = scmp.lt.s32.totalorder %s1104_s12, %s1104_s12 }
  0x1d   :  { %p1111_p0 = por %p1110_p13, %p1109_p12 }
  0x1f   :  { %p1112_p1 = pnand %p1111_p0, %p1105_p11 }
  0x21   :  { %1115 = shalt.err (!%p1112_p1)
}
  0x22   :  { %23 = dma.hbm_to_vmem [thread:$0]  %s1351_s0, 1536, %s1197_s18, [#allocation3], %s1168_s27, %s1168_s27, %s1169_s28  }
  0x23   :  { %s1170_s14 = smov [#allocation7]   ;;  %s1116_s19 = scalar_lea.hbm %s1353_s2, 256 }
  0x24   :  { %s41_s15 = sshll.u32 %s1170_s14, 4  ;;  %p1117_p2 = scmp.ne.s32.totalorder %s1353_s2, %s1116_s19  ;;  %s42_s15 = int_to_ptr.vmem [resolvable:$true] %s41_s15 }
  0x25   :  { %p1120_p3 = scmp.lt.u32.totalorder %s1116_s19, %s1353_s2 }
  0x27   :  { %p1122_p4 = pnand %p1120_p3, %p1117_p2 }
  0x29   :  { %1125 = shalt.err (!%p1122_p4)
}
  0x2a   :  { %s1126_s24 = scalar_lea.vmem %s42_s15, 256  ;;  %p1131_p6 = scmp.lt.s32.totalorder %s42_s15, %s42_s15 }
  0x2b   :  { %p1127_p5 = scmp.ne.s32.totalorder %s42_s15, %s1126_s24  ;;  %p1132_p7 = scmp.lt.s32.totalorder %s1126_s24, %s1126_s24 }
  0x2d   :  { %p1133_p8 = por %p1132_p7, %p1131_p6 }
  0x2f   :  { %p1134_p9 = pnand %p1133_p8, %p1127_p5 }
  0x31   :  { %1137 = shalt.err (!%p1134_p9)
}
  0x32   :  { %47 = dma.hbm_to_vmem [thread:$0]  %s1353_s2, 256, %s42_s15, [#allocation6], %s1168_s27, %s1168_s27, %s1169_s28  }
  0x33   :  { %1160 = dma.done.wait [#allocation3], 1536  }
  0x34   :  { %1161 = vsyncadd [#allocation3], 4294965760 }
  0x35   :  { %1162 = dma.done.wait [#allocation6], 1792  }
  0x36   :  { %1163 = vsyncadd [#allocation6], 4294965504  ;;  %v95_v0 = vld [vmem:[%s1354_s3] sm:$0xff]  ;;  %v96_v1 = vld [vmem:[%s1354_s3 + $0x8] sm:$0xff]  ;;  %vm97_vm0 = vcmask 130048   ;;  %s1171_s2 = smov [#allocation8]  }
  0x37   :  { %v59_v2 = vld [vmem:[#allocation2] sm:$0xff]  ;;  %v1033_v3 = vpack.c.bf16 %v96_v1, %v95_v0  ;;  %v60_v5 = vld [vmem:[#allocation2 + $0x8] sm:$0xff]  ;;  %v61_v8 = vld [vmem:[#allocation2 + $0x10] sm:$0xff]  ;;  %s927_s3 = sshll.u32 %s1171_s2, 4  ;;  %vm919_vm1 = vcmask 0   ;;  %s928_s3 = int_to_ptr.vmem [resolvable:$true] %s927_s3 }
  0x38   :  { %v71_v4 = vld [vmem:[#allocation5] sm:$0xff]  ;;  %v72_v6 = vld [vmem:[#allocation5 + $0x8] sm:$0xff]  ;;  %v73_v9 = vld [vmem:[#allocation5 + $0x10] sm:$0xff]  ;;  %s1138_s27 = scalar_lea.vmem %s928_s3, 16  ;;  %s1142_s28 = scalar_lea.vmem %s928_s3, 32 }
  0x39   :  { %v1255_v7 = vsub.f32 %v59_v2, %v71_v4  ;;  %1034 = vmatprep.subr.bf16.mxu0 %v1033_v3  ;;  %v1257_v10 = vsub.f32 %v60_v5, %v72_v6  ;;  %v1261_v11 = vsub.f32 %v61_v8, %v73_v9  ;;  %v62_v12 = vld [vmem:[#allocation2 + $0x18] sm:$0xff]  ;;  %v63_v14 = vld [vmem:[#allocation2 + $0x20] sm:$0xff]  ;;  %v64_v18 = vld [vmem:[#allocation2 + $0x28] sm:$0xff]  ;;  %p1139_p10 = scmp.ne.s32.totalorder %s928_s3, %s1138_s27  ;;  %p1143_p11 = scmp.lt.s32.totalorder %s928_s3, %s928_s3 }
  0x3a   :  { %1036 = vmatpush3.bf16.msra.mxu0 %v1033_v3  ;;  %v74_v13 = vld [vmem:[#allocation5 + $0x18] sm:$0xff]  ;;  %v75_v15 = vld [vmem:[#allocation5 + $0x20] sm:$0xff]  ;;  %v76_v19 = vld [vmem:[#allocation5 + $0x28] sm:$0xff]  ;;  %p1144_p12 = scmp.lt.s32.totalorder %s1142_s28, %s1138_s27 }
  0x3b   :  { %993 = vmatprep.mubr.msk.f32.mxu0 %vm97_vm0, %v1255_v7  ;;  %v1265_v16 = vsub.f32 %v62_v12, %v74_v13  ;;  %v1269_v17 = vsub.f32 %v63_v14, %v75_v15  ;;  %v65_v20 = vld [vmem:[#allocation2 + $0x30] sm:$0xff]  ;;  %v1273_v22 = vsub.f32 %v64_v18, %v76_v19  ;;  %v66_v24 = vld [vmem:[#allocation2 + $0x38] sm:$0xff]  ;;  %v67_v26 = vld [vmem:[#allocation2 + $0x40] sm:$0xff] }
  0x3c   :  { %v77_v21 = vld [vmem:[#allocation5 + $0x30] sm:$0xff]  ;;  %v78_v25 = vld [vmem:[#allocation5 + $0x38] sm:$0xff]  ;;  %v79_v27 = vld [vmem:[#allocation5 + $0x40] sm:$0xff]  ;;  %p1145_p13 = por %p1144_p12, %p1143_p11 }
  0x3d   :  { %994 = vmatmul.mubr.msk.f32.vlgmr.msra.gmra.mrb[0].mxu0 %vm97_vm0, %v1257_v10  ;;  %v1277_v23 = vsub.f32 %v65_v20, %v77_v21  ;;  %v1281_v28 = vsub.f32 %v66_v24, %v78_v25  ;;  %v1285_v29 = vsub.f32 %v67_v26, %v79_v27  ;;  %v68_v30 = vld [vmem:[#allocation2 + $0x48] sm:$0xff]  ;;  %v69_v32 = vld [vmem:[#allocation2 + $0x50] sm:$0xff]  ;;  %v70_v36 = vld [vmem:[#allocation2 + $0x58] sm:$0xff] }
  0x3e   :  { %996 = vmatprep.mubr.msk.f32.mxu0 %vm97_vm0, %v1261_v11  ;;  %v80_v31 = vld [vmem:[#allocation5 + $0x48] sm:$0xff]  ;;  %v81_v33 = vld [vmem:[#allocation5 + $0x50] sm:$0xff]  ;;  %v82_v37 = vld [vmem:[#allocation5 + $0x58] sm:$0xff]  ;;  %p1146_p0 = pnand %p1145_p13, %p1139_p10 }
  0x3f   :  { %v1289_v34 = vsub.f32 %v68_v30, %v80_v31  ;;  %v1293_v35 = vsub.f32 %v69_v32, %v81_v33  ;;  %v1297_v38 = vsub.f32 %v70_v36, %v82_v37  ;;  %v451_v40 = vld [vmem:[#allocation7] sm:$0xff]  ;;  %v452_v41 = vld [vmem:[#allocation7 + $0x8] sm:$0xff] }
  0x40   :  { %v1037_v43 = vpack.c.bf16 %v452_v41, %v451_v40 }
  0x41   :  { %997 = vmatmul.mubr.msk.f32.gmra.mrb[2].mxu0 %vm97_vm0, %v1265_v16 }
  0x42   :  { %999 = vmatprep.mubr.msk.f32.mxu0 %vm97_vm0, %v1269_v17  ;;  %1038 = vmatprep.subr.bf16.mxu1 %v1037_v43 }
  0x43   :  { %1040 = vmatpush3.bf16.msra.mxu1 %v1037_v43 }
  0x45   :  { %1000 = vmatmul.mubr.msk.f32.gmra.mrb[4].mxu0 %vm97_vm0, %v1273_v22 }
  0x46   :  { %1002 = vmatprep.mubr.msk.f32.mxu0 %vm97_vm0, %v1277_v23 }
  0x49   :  { %1003 = vmatmul.mubr.msk.f32.gmra.mrb[6].mxu0 %vm97_vm0, %v1281_v28 }
  0x4a   :  { %1005 = vmatprep.mubr.msk.f32.mxu0 %vm97_vm0, %v1285_v29 }
  0x4d   :  { %1006 = vmatmul.mubr.msk.f32.gmra.mrb[8].mxu0 %vm97_vm0, %v1289_v34 }
  0x4e   :  { %1008 = vmatprep.mubr.msk.f32.mxu0 %vm97_vm0, %v1293_v35 }
  0x51   :  { %1009 = vmatmul.mubr.msk.f32.gmra.mrb[10].mxu0 %vm97_vm0, %v1297_v38 }
 0x110   :  { %v995_v39 = vpop.f32.mrb[0].mxu0 }
 0x111   :  { %v200_v42 = vpop.f32.mrb[1].mxu0 }
 0x112   :  { %259 = vxpose.xlu0.b32.start [1/2] (short) (narrow) %v200_v42, 16 }
 0x114   :  { %v998_v44 = vpop.f32.mrb[2].mxu0 }
 0x115   :  { %v210_v45 = vpop.f32.mrb[3].mxu0 }
 0x116   :  { %260 = vxpose.xlu0.b32.end [2/2] (short) (narrow) %v995_v39, 16  ;;  %291 = vxpose.xlu1.b32.start [1/2] (short) (narrow) %v210_v45, 16 }
 0x118   :  { %v1001_v46 = vpop.f32.mrb[4].mxu0 }
 0x119   :  { %v220_v47 = vpop.f32.mrb[5].mxu0 }
 0x11a   :  { %292 = vxpose.xlu1.b32.end [2/2] (short) (narrow) %v998_v44, 16  ;;  %323 = vxpose.xlu0.b32.start [1/2] (short) (narrow) %v220_v47, 16 }
 0x11c   :  { %v1004_v48 = vpop.f32.mrb[6].mxu0 }
 0x11d   :  { %v230_v49 = vpop.f32.mrb[7].mxu0 }
 0x11e   :  { %324 = vxpose.xlu0.b32.end [2/2] (short) (narrow) %v1001_v46, 16  ;;  %355 = vxpose.xlu1.b32.start [1/2] (short) (narrow) %v230_v49, 16 }
 0x120   :  { %v1007_v50 = vpop.f32.mrb[8].mxu0 }
 0x121   :  { %v240_v51 = vpop.f32.mrb[9].mxu0 }
 0x122   :  { %356 = vxpose.xlu1.b32.end [2/2] (short) (narrow) %v1004_v48, 16  ;;  %387 = vxpose.xlu0.b32.start [1/2] (short) (narrow) %v240_v51, 16 }
 0x124   :  { %v1010_v52 = vpop.f32.mrb[10].mxu0 }
 0x125   :  { %v250_v53 = vpop.f32.mrb[11].mxu0 }
 0x126   :  { %388 = vxpose.xlu0.b32.end [2/2] (short) (narrow) %v1007_v50, 16  ;;  %419 = vxpose.xlu1.b32.start [1/2] (short) (narrow) %v250_v53, 16 }
 0x12a   :  { %420 = vxpose.xlu1.b32.end [2/2] (short) (narrow) %v1010_v52, 16 }
 0x192   :  { %v275_v54 = vpop.trf.xlu0 }
 0x193   :  { %1015 = vmatprep.mubr.msk.f32.mxu1 %vm97_vm0, %v275_v54 }
 0x196   :  { %v276_v55 = vpop.trf.xlu0  ;;  %v307_v56 = vpop.trf.xlu1 }
 0x197   :  { %1016 = vmatmul.mubr.msk.f32.vlgmr.msra.gmra.mrb[0].mxu1 %vm97_vm0, %v276_v55 }
 0x198   :  { %1018 = vmatprep.mubr.msk.f32.mxu1 %vm97_vm0, %v307_v56 }
 0x19a   :  { %v308_v57 = vpop.trf.xlu1  ;;  %v339_v58 = vpop.trf.xlu0 }
 0x19b   :  { %1019 = vmatmul.mubr.msk.f32.gmra.mrb[2].mxu1 %vm97_vm0, %v308_v57 }
 0x19c   :  { %1021 = vmatprep.mubr.msk.f32.mxu1 %vm97_vm0, %v339_v58 }
 0x19e   :  { %v340_v59 = vpop.trf.xlu0  ;;  %v371_v60 = vpop.trf.xlu1 }
 0x19f   :  { %1022 = vmatmul.mubr.msk.f32.gmra.mrb[4].mxu1 %vm97_vm0, %v340_v59 }
 0x1a0   :  { %1024 = vmatprep.mubr.msk.f32.mxu1 %vm97_vm0, %v371_v60 }
 0x1a2   :  { %v372_v61 = vpop.trf.xlu1  ;;  %v403_v62 = vpop.trf.xlu0 }
 0x1a3   :  { %1025 = vmatmul.mubr.msk.f32.gmra.mrb[6].mxu1 %vm97_vm0, %v372_v61 }
 0x1a4   :  { %1027 = vmatprep.mubr.msk.f32.mxu1 %vm97_vm0, %v403_v62 }
 0x1a6   :  { %v404_v63 = vpop.trf.xlu0  ;;  %v435_v0 = vpop.trf.xlu1 }
 0x1a7   :  { %1028 = vmatmul.mubr.msk.f32.gmra.mrb[8].mxu1 %vm97_vm0, %v404_v63 }
 0x1a8   :  { %1030 = vmatprep.mubr.msk.f32.mxu1 %vm97_vm0, %v435_v0 }
 0x1aa   :  { %v436_v1 = vpop.trf.xlu1 }
 0x1ab   :  { %1031 = vmatmul.mubr.msk.f32.gmra.mrb[10].mxu1 %vm97_vm0, %v436_v1 }
 0x26a   :  { %v1017_v2 = vpop.f32.mrb[0].mxu1 }
 0x26b   :  { %v555_v3 = vpop.f32.mrb[1].mxu1 }
 0x26c   :  { %614 = vxpose.xlu0.b32.start [1/2] (short) (narrow) %v555_v3, 16 }
 0x26e   :  { %v1020_v4 = vpop.f32.mrb[2].mxu1 }
 0x26f   :  { %v565_v5 = vpop.f32.mrb[3].mxu1 }
 0x270   :  { %615 = vxpose.xlu0.b32.end [2/2] (short) (narrow) %v1017_v2, 16  ;;  %646 = vxpose.xlu1.b32.start [1/2] (short) (narrow) %v565_v5, 16 }
 0x272   :  { %v1023_v6 = vpop.f32.mrb[4].mxu1 }
 0x273   :  { %v575_v8 = vpop.f32.mrb[5].mxu1 }
 0x274   :  { %678 = vxpose.xlu0.b32.start [1/2] (short) (narrow) %v575_v8, 16  ;;  %647 = vxpose.xlu1.b32.end [2/2] (short) (narrow) %v1020_v4, 16 }
 0x276   :  { %v1026_v9 = vpop.f32.mrb[6].mxu1 }
 0x277   :  { %v585_v12 = vpop.f32.mrb[7].mxu1 }
 0x278   :  { %679 = vxpose.xlu0.b32.end [2/2] (short) (narrow) %v1023_v6, 16  ;;  %710 = vxpose.xlu1.b32.start [1/2] (short) (narrow) %v585_v12, 16 }
 0x27a   :  { %v1029_v13 = vpop.f32.mrb[8].mxu1 }
 0x27b   :  { %v595_v14 = vpop.f32.mrb[9].mxu1 }
 0x27c   :  { %742 = vxpose.xlu0.b32.start [1/2] (short) (narrow) %v595_v14, 16  ;;  %711 = vxpose.xlu1.b32.end [2/2] (short) (narrow) %v1026_v9, 16 }
 0x27e   :  { %v1032_v15 = vpop.f32.mrb[10].mxu1 }
 0x27f   :  { %v605_v18 = vpop.f32.mrb[11].mxu1 }
 0x280   :  { %743 = vxpose.xlu0.b32.end [2/2] (short) (narrow) %v1029_v13, 16  ;;  %774 = vxpose.xlu1.b32.start [1/2] (short) (narrow) %v605_v18, 16 }
 0x284   :  { %775 = vxpose.xlu1.b32.end [2/2] (short) (narrow) %v1032_v15, 16 }
 0x2ec   :  { %v630_v19 = vpop.trf.xlu0 }
 0x2ed   :  { %v806_v20 = vsub.f32 %v1255_v7, %v630_v19 }
 0x2ef   :  { %v818_v21 = vmul.f32 %v806_v20, %v806_v20 }
 0x2f0   :  { %v631_v24 = vpop.trf.xlu0  ;;  %v662_v25 = vpop.trf.xlu1 }
 0x2f1   :  { %v830_v26 = vadd.f32 1e-06, %v818_v21  ;;  %v807_v27 = vsub.f32 %v1257_v10, %v631_v24  ;;  %v808_v30 = vsub.f32 %v1261_v11, %v662_v25 }
 0x2f3   :  { %1048 = vrsqrt.f32 %v830_v26  ;;  %v819_v31 = vmul.f32 %v807_v27, %v807_v27  ;;  %v820_v32 = vmul.f32 %v808_v30, %v808_v30 }
 0x2f4   :  { %v694_v33 = vpop.trf.xlu0  ;;  %v663_v36 = vpop.trf.xlu1 }
 0x2f5   :  { %v831_v37 = vadd.f32 1e-06, %v819_v31  ;;  %v832_v39 = vadd.f32 1e-06, %v820_v32  ;;  %v810_v40 = vsub.f32 %v1269_v17, %v694_v33  ;;  %v809_v41 = vsub.f32 %v1265_v16, %v663_v36 }
 0x2f7   :  { %1050 = vrsqrt.f32 %v831_v37  ;;  %v822_v7 = vmul.f32 %v810_v40, %v810_v40  ;;  %v821_v42 = vmul.f32 %v809_v41, %v809_v41 }
 0x2f8   :  { %1052 = vrsqrt.f32 %v832_v39  ;;  %v695_v43 = vpop.trf.xlu0  ;;  %v726_v44 = vpop.trf.xlu1 }
 0x2f9   :  { %v834_v10 = vadd.f32 1e-06, %v822_v7  ;;  %v833_v45 = vadd.f32 1e-06, %v821_v42  ;;  %v811_v11 = vsub.f32 %v1273_v22, %v695_v43  ;;  %v812_v46 = vsub.f32 %v1277_v23, %v726_v44 }
 0x2fb   :  { %1054 = vrsqrt.f32 %v834_v10  ;;  %v823_v47 = vmul.f32 %v811_v11, %v811_v11  ;;  %v824_v48 = vmul.f32 %v812_v46, %v812_v46 }
 0x2fc   :  { %1056 = vrsqrt.f32 %v833_v45  ;;  %v758_v49 = vpop.trf.xlu0  ;;  %v727_v17 = vpop.trf.xlu1 }
 0x2fd   :  { %v1049_v50 = vpop.eup %1048  ;;  %v835_v16 = vadd.f32 1e-06, %v823_v47  ;;  %v836_v51 = vadd.f32 1e-06, %v824_v48  ;;  %v814_v52 = vsub.f32 %v1285_v29, %v758_v49  ;;  %v813_v53 = vsub.f32 %v1281_v28, %v727_v17 }
 0x2fe   :  { %v854_v54 = vmul.f32 %v1049_v50, %v830_v26 }
 0x2ff   :  { %1058 = vrsqrt.f32 %v835_v16  ;;  %v826_v55 = vmul.f32 %v814_v52, %v814_v52  ;;  %v825_v56 = vmul.f32 %v813_v53, %v813_v53 }
 0x300   :  { %1060 = vrsqrt.f32 %v836_v51  ;;  %v759_v22 = vpop.trf.xlu0  ;;  %v790_v23 = vpop.trf.xlu1  ;;  %v866_v57 = vsel %vm97_vm0, %v854_v54, 0.0 }
 0x301   :  { %v1051_v58 = vpop.eup %1050  ;;  %v838_v59 = vadd.f32 1e-06, %v826_v55  ;;  %v837_v60 = vadd.f32 1e-06, %v825_v56  ;;  %v815_v61 = vsub.f32 %v1289_v34, %v759_v22  ;;  %v816_v62 = vsub.f32 %v1293_v35, %v790_v23  ;;  %867 = vadd.xlane.f32.xlu0 %v866_v57 }
 0x302   :  { %v1053_v29 = vpop.eup %1052  ;;  %v855_v63 = vmul.f32 %v1051_v58, %v831_v37 }
 0x303   :  { %1062 = vrsqrt.f32 %v838_v59  ;;  %v827_v28 = vmul.f32 %v815_v61, %v815_v61  ;;  %v828_v0 = vmul.f32 %v816_v62, %v816_v62  ;;  %v856_v3 = vmul.f32 %v1053_v29, %v832_v39 }
 0x304   :  { %1064 = vrsqrt.f32 %v837_v60  ;;  %v791_v1 = vpop.trf.xlu1  ;;  %v869_v2 = vsel %vm97_vm0, %v855_v63, 0.0 }
 0x305   :  { %v1055_v4 = vpop.eup %1054  ;;  %v839_v5 = vadd.f32 1e-06, %v827_v28  ;;  %v840_v6 = vadd.f32 1e-06, %v828_v0  ;;  %v817_v8 = vsub.f32 %v1297_v38, %v791_v1  ;;  %870 = vadd.xlane.f32.xlu1 %v869_v2  ;;  %v872_v13 = vsel %vm97_vm0, %v856_v3, 0.0 }
 0x306   :  { %v1057_v34 = vpop.eup %1056  ;;  %v858_v9 = vmul.f32 %v1055_v4, %v834_v10 }
 0x307   :  { %1066 = vrsqrt.f32 %v839_v5  ;;  %v829_v35 = vmul.f32 %v817_v8, %v817_v8  ;;  %v857_v14 = vmul.f32 %v1057_v34, %v833_v45 }
 0x308   :  { %1068 = vrsqrt.f32 %v840_v6  ;;  %v878_v12 = vsel %vm97_vm0, %v858_v9, 0.0 }
 0x309   :  { %v1059_v15 = vpop.eup %1058  ;;  %v841_v18 = vadd.f32 1e-06, %v829_v35  ;;  %879 = vadd.xlane.f32.xlu0 %v878_v12  ;;  %873 = vadd.xlane.f32.xlu1 %v872_v13  ;;  %v875_v38 = vsel %vm97_vm0, %v857_v14, 0.0 }
 0x30a   :  { %v1061_v19 = vpop.eup %1060  ;;  %v859_v21 = vmul.f32 %v1059_v15, %v835_v16 }
 0x30b   :  { %1070 = vrsqrt.f32 %v841_v18  ;;  %v860_v20 = vmul.f32 %v1061_v19, %v836_v51 }
 0x30c   :  { %v881_v30 = vsel %vm97_vm0, %v859_v21, 0.0 }
 0x30d   :  { %v1063_v24 = vpop.eup %1062  ;;  %876 = vadd.xlane.f32.xlu1 %v875_v38  ;;  %v884_v25 = vsel %vm97_vm0, %v860_v20, 0.0 }
 0x30e   :  { %v1065_v26 = vpop.eup %1064  ;;  %885 = vadd.xlane.f32.xlu0 %v884_v25  ;;  %v862_v27 = vmul.f32 %v1063_v24, %v838_v59 }
 0x30f   :  { %v861_v32 = vmul.f32 %v1065_v26, %v837_v60 }
 0x310   :  { %v890_v31 = vsel %vm97_vm0, %v862_v27, 0.0 }
 0x311   :  { %v1067_v33 = vpop.eup %1066  ;;  %882 = vadd.xlane.f32.xlu1 %v881_v30  ;;  %v887_v39 = vsel %vm97_vm0, %v861_v32, 0.0 }
 0x312   :  { %v1069_v36 = vpop.eup %1068  ;;  %891 = vadd.xlane.f32.xlu0 %v890_v31  ;;  %v863_v40 = vmul.f32 %v1067_v33, %v839_v5 }
 0x313   :  { %v864_v37 = vmul.f32 %v1069_v36, %v840_v6 }
 0x314   :  { %v893_v42 = vsel %vm97_vm0, %v863_v40, 0.0 }
 0x315   :  { %v1071_v41 = vpop.eup %1070  ;;  %888 = vadd.xlane.f32.xlu1 %v887_v39  ;;  %v896_v7 = vsel %vm97_vm0, %v864_v37, 0.0 }
 0x316   :  { %897 = vadd.xlane.f32.xlu0 %v896_v7  ;;  %v865_v43 = vmul.f32 %v1071_v41, %v841_v18 }
 0x318   :  { %v899_v44 = vsel %vm97_vm0, %v865_v43, 0.0 }
 0x319   :  { %894 = vadd.xlane.f32.xlu1 %v893_v42 }
 0x31d   :  { %900 = vadd.xlane.f32.xlu1 %v899_v44 }
 0x38e   :  { %v868_v10 = vpop.xlane.xlu0 %867 }
 0x392   :  { %v871_v45 = vpop.xlane.xlu1 %870 }
 0x393   :  { %v902_v47 = vadd.f32 %v871_v45, %v868_v10 }
 0x396   :  { %v880_v11 = vpop.xlane.xlu0 %879  ;;  %v874_v46 = vpop.xlane.xlu1 %873 }
 0x397   :  { %v903_v48 = vadd.f32 %v902_v47, %v874_v46 }
 0x39a   :  { %v877_v49 = vpop.xlane.xlu1 %876 }
 0x39b   :  { %v904_v17 = vadd.f32 %v903_v48, %v877_v49  ;;  %v886_v50 = vpop.xlane.xlu0 %885 }
 0x39d   :  { %v905_v16 = vadd.f32 %v904_v17, %v880_v11 }
 0x39e   :  { %v883_v51 = vpop.xlane.xlu1 %882 }
 0x39f   :  { %v906_v52 = vadd.f32 %v905_v16, %v883_v51  ;;  %v892_v54 = vpop.xlane.xlu0 %891 }
 0x3a1   :  { %v907_v53 = vadd.f32 %v906_v52, %v886_v50 }
 0x3a2   :  { %v889_v55 = vpop.xlane.xlu1 %888 }
 0x3a3   :  { %v908_v56 = vadd.f32 %v907_v53, %v889_v55  ;;  %v898_v58 = vpop.xlane.xlu0 %897 }
 0x3a5   :  { %v909_v22 = vadd.f32 %v908_v56, %v892_v54 }
 0x3a6   :  { %v895_v23 = vpop.xlane.xlu1 %894 }
 0x3a7   :  { %v910_v57 = vadd.f32 %v909_v22, %v895_v23 }
 0x3a9   :  { %v911_v59 = vadd.f32 %v910_v57, %v898_v58 }
 0x3aa   :  { %v901_v60 = vpop.xlane.xlu1 %900 }
 0x3ab   :  { %v912_v61 = vadd.f32 %v911_v59, %v901_v60 }
 0x3ad   :  { %v913_v62 = vrot.slane %v912_v61, 4 }
 0x3af   :  { %v914_v29 = vadd.f32 %v913_v62, %v912_v61 }
 0x3b1   :  { %v915_v63 = vrot.slane %v914_v29, 2 }
 0x3b3   :  { %v916_v28 = vadd.f32 %v915_v63, %v914_v29 }
 0x3b5   :  { %v917_v0 = vrot.slane %v916_v28, 1 }
 0x3b7   :  { %v918_v1 = vadd.f32 %v917_v0, %v916_v28 }
 0x3b9   :  { %920 = vst.msk [vmem:[#allocation8] sm:$0x1] %vm919_vm1, %v918_v1 }
 0x3ba   :  { %1149 = shalt.err (!%p1146_p0)
}
 0x3bb   :  { %s1150_s7 = scalar_lea.hbm %s1355_s4, 16 }
 0x3bc   :  { %p1151_p1 = scmp.ne.s32.totalorder %s1355_s4, %s1150_s7  ;;  %p1154_p2 = scmp.lt.u32.totalorder %s1150_s7, %s1355_s4 }
 0x3be   :  { %p1156_p3 = pnand %p1154_p2, %p1151_p1 }
 0x3c0   :  { %1159 = shalt.err (!%p1156_p3)
}
 0x3c1   :  { %930 = dma.vmem_to_hbm [thread:$0]  %s928_s3, 16, %s1355_s4, [#allocation4]  }
 0x3c2   :  { %1164 = dma.done.wait [#allocation4], 16  }
 0x3c3   :  { %1165 = vsyncadd [#allocation4], 4294967280 }
 0x3c4   :  { %934 = vsyncpa [#allocation3], 1 }
 0x3c5   :  { %935 = vsyncpa [#allocation6], 1 }
 0x3c6   :  { %936 = vsyncpa [#allocation4], 1 }

</bundles_post_ra>
